<compile_context>
chip_gen: v5e
topology: v5e:2x2
jax: 0.10.0
libtpu: 0.0.40
codegen_flags: <defaults>
</compile_context>

<pallas_src>
import functools

import jax
import jax.numpy as jnp
from jax.experimental import pallas as pl
from jax.experimental.pallas import tpu as pltpu

_LANE = 128
_MIN_PIPELINE_STEPS = 4          # keep >=4 grid steps so in/compute/out overlap
_ONE_MIB = 1024 * 1024


def _hsigmoid_kernel(x_ref, o_ref, *, bias, scale, min_value, max_value,
                     compute_dtype):
    x = x_ref[...].astype(compute_dtype)
    y = jnp.clip((x + bias) * scale, min_value, max_value)
    o_ref[...] = y.astype(o_ref.dtype)


@functools.lru_cache(maxsize=1)
def _vmem_capacity_bytes():
    # v5e/v6e: 128 MiB per TC, v7x: 64 MiB per TC.  Fall back conservatively.
    try:
        return int(pltpu.get_tpu_info().vmem_capacity_bytes)
    except Exception:
        return 128 * 1024 * 1024


def _choose_cols(n):
    """Widest lane-dense column count (multiple of 128) dividing n, or None."""
    for cols in (4096, 2048, 1024, 512, 256, 128):
        if n % cols == 0:
            return cols
    return None


def _round_down(v, m):
    return (v // m) * m


def hsigmoid(x, bias=3.0, divisor=6.0, min_value=0.0, max_value=1.0,
             donate=False):
    """Elementwise hard-sigmoid: clamp((x + bias) / divisor, min, max)."""
    assert divisor != 0
    orig_shape = x.shape
    orig_dtype = x.dtype
    n = x.size
    if n == 0:
        return x

    scale = 1.0 / float(divisor)          # multiply inside the kernel, never divide
    dtype_bytes = jnp.dtype(orig_dtype).itemsize

    # Native half-precision math (v6e/v7x have bf16 VPUs; Mosaic legalizes on
    # v5e).  Everything else runs the VPU in f32.
    if jnp.issubdtype(orig_dtype, jnp.floating) and dtype_bytes <= 2:
        compute_dtype = orig_dtype
    else:
        compute_dtype = jnp.float32

    # VMEM budget: 2 in + 2 out double buffers = 4x block, plus compiler
    # scratch, must stay under the per-TC capacity on every generation
    # (v7x = 64 MiB; v5e/v6e = 128 MiB).
    vmem_cap = _vmem_capacity_bytes()
    vmem_limit = int(min(48 * _ONE_MIB, (vmem_cap * 3) // 4))
    block_bytes = int(min(8 * _ONE_MIB, vmem_limit // 6))

    # Sublane multiple for this dtype's packing (f32: 8, bf16: 16, int8: 32).
    sub = max(8, 32 // max(1, dtype_bytes))

    cols = _choose_cols(n)
    if cols is not None:
        # ---- common case: zero-copy lane-dense slab, grid over rows. -------
        rows = n // cols
        x2d = x.reshape(rows, cols)

        max_rows = max(sub, _round_down(block_bytes // (cols * dtype_bytes), sub))
        tile_rows = min(rows, max_rows)

        # Guarantee pipeline depth (and give a multi-TC v7x chip >=2 steps per
        # core) once the tensor is big enough for it to matter.
        if n * dtype_bytes > _ONE_MIB and rows >= _MIN_PIPELINE_STEPS * sub:
            per_step = max(sub, _round_down(pl.cdiv(rows, _MIN_PIPELINE_STEPS), sub))
            tile_rows = min(tile_rows, per_step)
        if tile_rows != rows:
            tile_rows = max(sub, _round_down(tile_rows, sub))

        grid = (pl.cdiv(rows, tile_rows),)
        block = (tile_rows, cols)
        index_map = lambda i: (i, 0)
    else:
        # ---- ragged case (n % 128 != 0): no pad, no output slice. ----------
        # Zero-copy reshape to (8, n/8) when possible (no sublane waste),
        # else (1, n).  Grid marches along the lane axis in 128-multiples and
        # Pallas clips the partial last block on the output DMA.
        rows = 8 if n % 8 == 0 else 1
        cols_r = n // rows
        x2d = x.reshape(rows, cols_r)

        # Worst-case VMEM layout pads sublanes to 8 and elements to 32 bits.
        per_buf_budget = 4 * _ONE_MIB
        max_tile_cols = max(_LANE,
                            _round_down(per_buf_budget // (8 * 4), _LANE))
        tile_cols = min(max_tile_cols, pl.cdiv(cols_r, _LANE) * _LANE)

        grid = (pl.cdiv(cols_r, tile_cols),)
        block = (rows, tile_cols)
        index_map = lambda i: (0, i)

    kernel = functools.partial(
        _hsigmoid_kernel, bias=float(bias), scale=scale,
        min_value=float(min_value), max_value=float(max_value),
        compute_dtype=compute_dtype)

    # TODO(synk): on v7x, pltpu.CORE_PARALLEL (or an explicit core_map axis)
    # could force the row grid across both TensorCores; "parallel" is the
    # portable megacore hint and is a safe no-op on single-TC v5e/v6e.
    out2d = pl.pallas_call(
        kernel,
        out_shape=jax.ShapeDtypeStruct(x2d.shape, orig_dtype),
        grid=grid,
        in_specs=[pl.BlockSpec(block, index_map)],
        out_specs=pl.BlockSpec(block, index_map),
        input_output_aliases={0: 0} if donate else {},
        compiler_params=pltpu.CompilerParams(
            dimension_semantics=("parallel",),
            vmem_limit_bytes=vmem_limit),
        cost_estimate=pl.CostEstimate(
            flops=4 * n, transcendentals=0,
            bytes_accessed=2 * n * dtype_bytes),
    )(x2d)

    return out2d.reshape(orig_shape)


def _ref_hsigmoid(x, bias=3.0, divisor=6.0, min_value=0.0, max_value=1.0):
    return jnp.clip((x + bias) * (1.0 / divisor), min_value, max_value)


if __name__ == "__main__":
    key = jax.random.PRNGKey(0)

    # 1) Main lane-dense path (NCHW, n % 128 == 0).
    x = jax.random.normal(key, (2, 4, 16, 16), dtype=jnp.float32) * 4.0
    out = jax.block_until_ready(hsigmoid(x))
    ref = _ref_hsigmoid(x)
    assert out.shape == x.shape and out.dtype == x.dtype
    assert jnp.allclose(out, ref, atol=1e-6), "f32 main path mismatch"

    # 2) Ragged paths (n % 128 != 0): no pad / slice round trips.
    for shape in ((2, 3, 9, 7), (4, 10, 6)):          # n = 378 (odd rows), 240 (8-row slab)
        key, sub = jax.random.split(key)
        xr = jax.random.normal(sub, shape, dtype=jnp.float32) * 4.0
        outr = jax.block_until_ready(hsigmoid(xr))
        assert outr.shape == xr.shape
        assert jnp.allclose(outr, _ref_hsigmoid(xr), atol=1e-6), \
            f"ragged path mismatch for {shape}"

    # 3) bf16 native-compute path.
    xb = x.astype(jnp.bfloat16)
    outb = jax.block_until_ready(hsigmoid(xb))
    assert outb.dtype == jnp.bfloat16
    assert jnp.allclose(outb.astype(jnp.float32),
                        _ref_hsigmoid(xb).astype(jnp.float32),
                        atol=1e-2), "bf16 path mismatch"

    # 4) Aliased (donated) output — compute the reference first, then never
    #    touch the donated input again.
    key, sub = jax.random.split(key)
    xd = jax.random.normal(sub, (2, 4, 16, 16), dtype=jnp.float32) * 4.0
    refd = jax.block_until_ready(_ref_hsigmoid(xd))
    outd = jax.block_until_ready(hsigmoid(xd, donate=True))
    assert jnp.allclose(outd, refd, atol=1e-6), "donated path mismatch"

    print("KERNEL_OK")
</pallas_src>

<mosaic_0001>
module attributes {stable_mosaic.version = 11 : i64} {
  func.func @_hsigmoid_kernel(%arg0: i32, %arg1: memref<1x2048xf32, #tpu.memory_space<vmem>>, %arg2: memref<1x2048xf32, #tpu.memory_space<vmem>>) attributes {dimension_semantics = [#tpu.dimension_semantics<parallel>], iteration_bounds = array<i64: 1>, scalar_prefetch = 0 : i64, scratch_operands = 0 : i64, tpu.core_type = #tpu.core_type<tc>, window_params = [{transform_indices = @transform_0, window_bounds = array<i64: 1, 2048>}, {transform_indices = @transform_1, window_bounds = array<i64: 1, 2048>}]} {
    %c0 = arith.constant 0 : index
    %c0_0 = arith.constant 0 : index
    %0 = vector.load %arg1[%c0, %c0_0] : memref<1x2048xf32, #tpu.memory_space<vmem>>, vector<1x2048xf32>
    %cst = arith.constant 3.000000e+00 : f32
    %1 = vector.broadcast %cst : f32 to vector<1x2048xf32>
    %2 = arith.addf %0, %1 : vector<1x2048xf32>
    %cst_1 = arith.constant 0.166666672 : f32
    %3 = vector.broadcast %cst_1 : f32 to vector<1x2048xf32>
    %4 = arith.mulf %2, %3 : vector<1x2048xf32>
    %cst_2 = arith.constant 0.000000e+00 : f32
    %cst_3 = arith.constant 1.000000e+00 : f32
    %5 = vector.broadcast %cst_2 : f32 to vector<1x2048xf32>
    %6 = arith.maximumf %5, %4 : vector<1x2048xf32>
    %7 = vector.broadcast %cst_3 : f32 to vector<1x2048xf32>
    %8 = arith.minimumf %7, %6 : vector<1x2048xf32>
    %c0_4 = arith.constant 0 : index
    %c0_5 = arith.constant 0 : index
    %9 = vector.load %arg2[%c0_4, %c0_5] : memref<1x2048xf32, #tpu.memory_space<vmem>>, vector<1x2048xf32>
    tpu.vector_store %arg2[%c0_4, %c0_5], %8 {strides = array<i32>} : memref<1x2048xf32, #tpu.memory_space<vmem>>, vector<1x2048xf32>,
    return
  }
  func.func @transform_0(%arg0: i32) -> (i32, i32) {
    %c0_i32 = arith.constant 0 : i32
    %c0_i32_0 = arith.constant 0 : i32
    return %arg0, %c0_i32 : i32, i32
  }
  func.func @transform_1(%arg0: i32) -> (i32, i32) {
    %c0_i32 = arith.constant 0 : i32
    %c0_i32_0 = arith.constant 0 : i32
    return %arg0, %c0_i32 : i32, i32
  }
}

</mosaic_0001>

<bundles_post_ra>
// kernel: tpu_custom_call.1
= control target key start
LH: loop header
LB: loop body
LE: loop exit
PB: predicated region body
PF: predicated region fallthrough
CT: control target
= control target key end

     0   :  { %6 = vsyncpa [#allocation3], 0  ;;  %s124_s0 = inlined_call_operand.hbm [shape: f32[1,2048], index: 0, kind: input, shape index: {}]   ;;  %s125_s1 = inlined_call_operand.hbm [shape: f32[1,2048], index: 1, kind: output, shape index: {}]  }
   0x1   :  { %7 = vsyncpa [#allocation4], 0  ;;  %s13_s8 = sshll.u32 %s124_s0, 4  ;;  %s106_s9 = smov [#allocation2]   ;;  %s14_s8 = int_to_ptr.hbm [resolvable:$true] %s13_s8 }
   0x2   :  { %s15_s10 = sshll.u32 %s106_s9, 4  ;;  %s16_s10 = int_to_ptr.vmem [resolvable:$true] %s15_s10 }
   0x3   :  { %18 = dma.hbm_to_vmem [thread:$0]  %s14_s8, 256, %s16_s10, [#allocation3]  }
   0x4   :  { %102 = dma.done.wait [#allocation3], 256  }
   0x5   :  { %103 = vsyncadd [#allocation3], 4294967040  ;;  %v23_v0 = vld [vmem:[#allocation2] sm:$0xff]  ;;  %v24_v1 = vld [vmem:[#allocation2 + $0x8] sm:$0xff]  ;;  %s107_s11 = smov [#allocation5]   ;;  %s42_s0 = sshll.u32 %s125_s1, 4  ;;  %s43_s0 = int_to_ptr.hbm [resolvable:$true] %s42_s0 }
   0x6   :  { %v25_v2 = vadd.f32 3.0, %v23_v0  ;;  %v26_v3 = vadd.f32 3.0, %v24_v1  ;;  %s40_s12 = sshll.u32 %s107_s11, 4  ;;  %s41_s12 = int_to_ptr.vmem [resolvable:$true] %s40_s12 }
   0x8   :  { %v27_v4 = vmul.f32 0.16666667, %v25_v2  ;;  %v28_v5 = vmul.f32 0.16666667, %v26_v3 }
   0xa   :  { %v29_v6 = vmax.f32 %v27_v4, 0.0  ;;  %v30_v7 = vmax.f32 %v28_v5, 0.0 }
   0xc   :  { %v31_v8 = vmin.f32 %v29_v6, 1.0  ;;  %v32_v9 = vmin.f32 %v30_v7, 1.0 }
   0xe   :  { %33 = vst [vmem:[#allocation5] sm:$0xff] %v31_v8 }
   0xf   :  { %34 = vst [vmem:[#allocation5 + $0x8] sm:$0xff] %v32_v9 }
  0x10   :  { %45 = dma.vmem_to_hbm [thread:$0]  %s41_s12, 256, %s43_s0, [#allocation4]  }
  0x11   :  { %104 = dma.done.wait [#allocation4], 256  }
  0x12   :  { %105 = vsyncadd [#allocation4], 4294967040 }
  0x13   :  { %50 = vsyncpa [#allocation3], 1 }
  0x14   :  { %51 = vsyncpa [#allocation4], 1 }

</bundles_post_ra>
